<compile_context>
chip_gen: v7x
topology: tpu7x:2x2x1
jax: 0.10.0
libtpu: 0.0.40
codegen_flags: <defaults>
</compile_context>

<pallas_src>
import functools

import numpy as np
import jax
import jax.numpy as jnp
from jax import lax
from jax.experimental import pallas as pl
from jax.experimental.pallas import tpu as pltpu


_LANES = 128          # lane width of the reduce slab (multiple of 128)
_MAX_TILE_ROWS = 256  # sublane rows per grid step (multiple of 8)


# ---------------------------------------------------------------------------
# Kernel 1: GAE advantages + discounted value targets (backward recurrences).
# ---------------------------------------------------------------------------
def _gae_returns_kernel(r_ref, v_ref, adv_ref, vt_ref, *, gamma, lamb, T):
    g = jnp.float32(gamma)
    gl = jnp.float32(gamma * lamb)

    def body(i, carry):
        gae, ret, v_next = carry          # v_next == values[t + 1] (0 when t == T-1)
        t = T - 1 - i
        r_t = r_ref[t]
        v_t = v_ref[t]
        delta = r_t - v_t + g * v_next
        gae = gl * gae + delta
        ret = g * ret + r_t
        adv_ref[t] = gae
        vt_ref[t] = ret
        return gae, ret, v_t              # this v_t becomes next iteration's v[t+1]

    zero = jnp.float32(0.0)
    lax.fori_loop(0, T, body, (zero, zero, zero), unroll=8)


def _gae_and_value_targets(rewards, values, *, gamma, lamb):
    T = rewards.shape[0]
    kern = functools.partial(_gae_returns_kernel, gamma=gamma, lamb=lamb, T=T)
    smem = pl.BlockSpec(memory_space=pltpu.MemorySpace.SMEM)
    return pl.pallas_call(
        kern,
        out_shape=(jax.ShapeDtypeStruct((T,), jnp.float32),
                   jax.ShapeDtypeStruct((T,), jnp.float32)),
        in_specs=[smem, smem],
        out_specs=(smem, smem),
    )(rewards.astype(jnp.float32), values.astype(jnp.float32))


# ---------------------------------------------------------------------------
# Kernel 2: fused clip / value / entropy loss reduction over one stacked slab.
# ---------------------------------------------------------------------------
def _ppo_reduce_kernel(slab_ref, o_ref, acc_ref, *, eps, c1, c2, T):
    i = pl.program_id(0)

    @pl.when(i == 0)
    def _():
        acc_ref[...] = jnp.zeros_like(acc_ref)

    p = slab_ref[0]      # probs
    po = slab_ref[1]     # probs_old
    v = slab_ref[2]      # values
    adv = slab_ref[3]    # GAE advantages
    vt = slab_ref[4]     # discounted-return value targets
    tr, C = p.shape

    # In-kernel mask of the zero-padded tail against the static trajectory
    # length T (replaces the five wrapper-side pads with special fill values).
    rows = lax.broadcasted_iota(jnp.int32, (tr, C), 0) + i * tr
    cols = lax.broadcasted_iota(jnp.int32, (tr, C), 1)
    valid = rows * C + cols < T

    # ratio = probs / probs_old via EUP approx reciprocal + one Newton step
    # (VALU-free divide; the refinement keeps f32 parity with the reference).
    po_safe = jnp.where(valid, po, jnp.float32(1.0))
    inv = pl.reciprocal(po_safe, approx=True)
    inv = inv * (2.0 - po_safe * inv)
    ratio = p * inv

    clipped = jnp.clip(ratio, 1.0 - eps, 1.0 + eps)
    surr = jnp.minimum(ratio * adv, clipped * adv)      # clip-objective terms
    diff = v - vt                                       # MSE terms
    ent = p * jnp.log(p + 1e-5)                         # entropy terms (EUP log)

    # loss = sum(-surr) + c1 * sum(diff^2) + c2 * sum(-ent), fused elementwise.
    contrib = -surr + c1 * (diff * diff) - c2 * ent
    contrib = jnp.where(valid, contrib, jnp.float32(0.0))

    # Reduce (tr, C) -> (8, C) with pure vreg adds: each 8-row f32 slice is
    # exactly one vreg and the static slices never cross (8,128) tile
    # boundaries; one accumulator update per grid step.
    partial = contrib[0:8, :]
    for k in range(1, tr // 8):
        partial = partial + contrib[k * 8:(k + 1) * 8, :]
    acc_ref[...] += partial

    @pl.when(i == pl.num_programs(0) - 1)
    def _():
        # Single cross-lane/sublane reduce, done once at the end.
        o_ref[...] = jnp.sum(acc_ref[...], keepdims=True)


# ---------------------------------------------------------------------------
# Wrapper.
# ---------------------------------------------------------------------------
@functools.partial(jax.jit, static_argnames=("eps", "gamma", "lamb", "c1", "c2"))
def ppo_loss(probs, probs_old, rewards, values, *, eps, gamma, lamb, c1, c2):
    """Pallas implementation of PPOLoss.forward; returns a scalar float32."""
    T = probs.shape[0]

    # --- phase 1: backward recurrences (scalar unit, SMEM) -----------------
    adv, vt = _gae_and_value_targets(rewards, values, gamma=gamma, lamb=lamb)

    # --- phase 2: fused streaming reduction over one stacked slab ----------
    C = _LANES
    rows_needed = pl.cdiv(T, C)
    tile_r = min(_MAX_TILE_ROWS, ((rows_needed + 7) // 8) * 8)
    n_blocks = pl.cdiv(rows_needed, tile_r)
    R = n_blocks * tile_r

    # One stack + one zero-pad (fused under jit) instead of five jnp.pad
    # passes; the padded tail is masked in-kernel so the fill value is
    # irrelevant for correctness.
    stacked = jnp.stack([probs.astype(jnp.float32),
                         probs_old.astype(jnp.float32),
                         values.astype(jnp.float32),
                         adv, vt], axis=0)                       # (5, T)
    slab = jnp.pad(stacked, ((0, 0), (0, R * C - T))).reshape(5, R, C)

    kern = functools.partial(_ppo_reduce_kernel, eps=eps, c1=c1, c2=c2, T=T)
    out = pl.pallas_call(
        kern,
        out_shape=jax.ShapeDtypeStruct((1, 1), jnp.float32),
        grid_spec=pltpu.PrefetchScalarGridSpec(
            num_scalar_prefetch=0,
            grid=(n_blocks,),
            in_specs=[pl.BlockSpec((5, tile_r, C), lambda i: (0, i, 0))],
            out_specs=pl.BlockSpec((1, 1), lambda i: (0, 0)),
            scratch_shapes=[pltpu.VMEM((8, C), jnp.float32)],
        ),
        compiler_params=pltpu.CompilerParams(
            dimension_semantics=("arbitrary",),   # reduction axis
        ),
    )(slab)
    return out[0, 0]


# ---------------------------------------------------------------------------
# Reference (mirrors the PyTorch forward exactly, in float32 numpy).
# ---------------------------------------------------------------------------
def _reference_ppo_loss(probs, probs_old, rewards, values, *,
                        eps, gamma, lamb, c1, c2):
    p = np.asarray(probs, np.float32)
    po = np.asarray(probs_old, np.float32)
    r = np.asarray(rewards, np.float32)
    v = np.asarray(values, np.float32)
    T = p.shape[0]

    gaes = np.zeros(T, np.float32)
    gae = np.float32(0.0)
    for t in reversed(range(T)):
        if t == T - 1:
            delta = -v[t] + r[t]
        else:
            delta = -v[t] + r[t] + gamma * v[t + 1]
        gae = gamma * lamb * gae + delta
        gaes[t] = gae

    vt = np.zeros(T, np.float32)
    acc = np.float32(0.0)
    for t in reversed(range(T)):
        acc = acc * gamma + r[t]
        vt[t] = acc

    ratio = p / po
    clip_loss = -np.sum(np.minimum(ratio * gaes,
                                   np.clip(ratio, 1.0 - eps, 1.0 + eps) * gaes))
    value_loss = np.sum((v - vt) ** 2)
    entropy_loss = -np.sum(p * np.log(p + 1e-5))
    return np.float32(clip_loss + c1 * value_loss + c2 * entropy_loss)


if __name__ == "__main__":
    key = jax.random.PRNGKey(0)
    k1, k2, k3, k4 = jax.random.split(key, 4)
    T = 8  # small trajectory, consistent with the module's T-dim inputs

    probs = jax.nn.softmax(jax.random.normal(k1, (T,), jnp.float32))
    probs_old = jax.nn.softmax(jax.random.normal(k2, (T,), jnp.float32))
    rewards = jax.random.normal(k3, (T,), jnp.float32)
    values = jax.random.normal(k4, (T,), jnp.float32)

    hp = dict(eps=0.2, gamma=0.99, lamb=0.95, c1=0.5, c2=0.01)

    loss = jax.block_until_ready(
        ppo_loss(probs, probs_old, rewards, values, **hp))

    ref = _reference_ppo_loss(np.asarray(probs), np.asarray(probs_old),
                              np.asarray(rewards), np.asarray(values), **hp)

    assert np.allclose(float(loss), float(ref), rtol=1e-3, atol=1e-3), \
        (float(loss), float(ref))

    print("KERNEL_OK")
</pallas_src>

<mosaic_0001>
module attributes {stable_mosaic.version = 11 : i64} {
  func.func @_gae_returns_kernel(%arg0: memref<8xf32, #tpu.memory_space<smem>>, %arg1: memref<8xf32, #tpu.memory_space<smem>>, %arg2: memref<8xf32, #tpu.memory_space<smem>>, %arg3: memref<8xf32, #tpu.memory_space<smem>>) attributes {dimension_semantics = [], scalar_prefetch = 0 : i64, scratch_operands = 0 : i64, tpu.core_type = #tpu.core_type<tc>} {
    %cst = arith.constant 9.900000e-01 : f32
    %cst_0 = arith.constant 9.405000e-01 : f32
    %cst_1 = arith.constant 0.000000e+00 : f32
    %cst_2 = arith.constant 0.000000e+00 : f32
    %cst_3 = arith.constant 0.000000e+00 : f32
    %c0_i32 = arith.constant 0 : i32
    %c7_i32 = arith.constant 7 : i32
    %0 = arith.subi %c7_i32, %c0_i32 : i32
    %1 = arith.index_cast %0 : i32 to index
    %2 = memref.load %arg0[%1] : memref<8xf32, #tpu.memory_space<smem>>
    %3 = arith.index_cast %0 : i32 to index
    %4 = memref.load %arg1[%3] : memref<8xf32, #tpu.memory_space<smem>>
    %5 = arith.subf %2, %4 : f32
    %6 = arith.mulf %cst, %cst_3 : f32
    %7 = arith.addf %5, %6 : f32
    %8 = arith.mulf %cst_0, %cst_1 : f32
    %9 = arith.addf %8, %7 : f32
    %10 = arith.mulf %cst, %cst_2 : f32
    %11 = arith.addf %10, %2 : f32
    %12 = arith.index_cast %0 : i32 to index
    %13 = memref.load %arg2[%12] : memref<8xf32, #tpu.memory_space<smem>>
    memref.store %9, %arg2[%12] : memref<8xf32, #tpu.memory_space<smem>>
    %14 = arith.index_cast %0 : i32 to index
    %15 = memref.load %arg3[%14] : memref<8xf32, #tpu.memory_space<smem>>
    memref.store %11, %arg3[%14] : memref<8xf32, #tpu.memory_space<smem>>
    %c1_i32 = arith.constant 1 : i32
    %c7_i32_4 = arith.constant 7 : i32
    %16 = arith.subi %c7_i32_4, %c1_i32 : i32
    %17 = arith.index_cast %16 : i32 to index
    %18 = memref.load %arg0[%17] : memref<8xf32, #tpu.memory_space<smem>>
    %19 = arith.index_cast %16 : i32 to index
    %20 = memref.load %arg1[%19] : memref<8xf32, #tpu.memory_space<smem>>
    %21 = arith.subf %18, %20 : f32
    %22 = arith.mulf %cst, %4 : f32
    %23 = arith.addf %21, %22 : f32
    %24 = arith.mulf %cst_0, %9 : f32
    %25 = arith.addf %24, %23 : f32
    %26 = arith.mulf %cst, %11 : f32
    %27 = arith.addf %26, %18 : f32
    %28 = arith.index_cast %16 : i32 to index
    %29 = memref.load %arg2[%28] : memref<8xf32, #tpu.memory_space<smem>>
    memref.store %25, %arg2[%28] : memref<8xf32, #tpu.memory_space<smem>>
    %30 = arith.index_cast %16 : i32 to index
    %31 = memref.load %arg3[%30] : memref<8xf32, #tpu.memory_space<smem>>
    memref.store %27, %arg3[%30] : memref<8xf32, #tpu.memory_space<smem>>
    %c2_i32 = arith.constant 2 : i32
    %c7_i32_5 = arith.constant 7 : i32
    %32 = arith.subi %c7_i32_5, %c2_i32 : i32
    %33 = arith.index_cast %32 : i32 to index
    %34 = memref.load %arg0[%33] : memref<8xf32, #tpu.memory_space<smem>>
    %35 = arith.index_cast %32 : i32 to index
    %36 = memref.load %arg1[%35] : memref<8xf32, #tpu.memory_space<smem>>
    %37 = arith.subf %34, %36 : f32
    %38 = arith.mulf %cst, %20 : f32
    %39 = arith.addf %37, %38 : f32
    %40 = arith.mulf %cst_0, %25 : f32
    %41 = arith.addf %40, %39 : f32
    %42 = arith.mulf %cst, %27 : f32
    %43 = arith.addf %42, %34 : f32
    %44 = arith.index_cast %32 : i32 to index
    %45 = memref.load %arg2[%44] : memref<8xf32, #tpu.memory_space<smem>>
    memref.store %41, %arg2[%44] : memref<8xf32, #tpu.memory_space<smem>>
    %46 = arith.index_cast %32 : i32 to index
    %47 = memref.load %arg3[%46] : memref<8xf32, #tpu.memory_space<smem>>
    memref.store %43, %arg3[%46] : memref<8xf32, #tpu.memory_space<smem>>
    %c3_i32 = arith.constant 3 : i32
    %c7_i32_6 = arith.constant 7 : i32
    %48 = arith.subi %c7_i32_6, %c3_i32 : i32
    %49 = arith.index_cast %48 : i32 to index
    %50 = memref.load %arg0[%49] : memref<8xf32, #tpu.memory_space<smem>>
    %51 = arith.index_cast %48 : i32 to index
    %52 = memref.load %arg1[%51] : memref<8xf32, #tpu.memory_space<smem>>
    %53 = arith.subf %50, %52 : f32
    %54 = arith.mulf %cst, %36 : f32
    %55 = arith.addf %53, %54 : f32
    %56 = arith.mulf %cst_0, %41 : f32
    %57 = arith.addf %56, %55 : f32
    %58 = arith.mulf %cst, %43 : f32
    %59 = arith.addf %58, %50 : f32
    %60 = arith.index_cast %48 : i32 to index
    %61 = memref.load %arg2[%60] : memref<8xf32, #tpu.memory_space<smem>>
    memref.store %57, %arg2[%60] : memref<8xf32, #tpu.memory_space<smem>>
    %62 = arith.index_cast %48 : i32 to index
    %63 = memref.load %arg3[%62] : memref<8xf32, #tpu.memory_space<smem>>
    memref.store %59, %arg3[%62] : memref<8xf32, #tpu.memory_space<smem>>
    %c4_i32 = arith.constant 4 : i32
    %c7_i32_7 = arith.constant 7 : i32
    %64 = arith.subi %c7_i32_7, %c4_i32 : i32
    %65 = arith.index_cast %64 : i32 to index
    %66 = memref.load %arg0[%65] : memref<8xf32, #tpu.memory_space<smem>>
    %67 = arith.index_cast %64 : i32 to index
    %68 = memref.load %arg1[%67] : memref<8xf32, #tpu.memory_space<smem>>
    %69 = arith.subf %66, %68 : f32
    %70 = arith.mulf %cst, %52 : f32
    %71 = arith.addf %69, %70 : f32
    %72 = arith.mulf %cst_0, %57 : f32
    %73 = arith.addf %72, %71 : f32
    %74 = arith.mulf %cst, %59 : f32
    %75 = arith.addf %74, %66 : f32
    %76 = arith.index_cast %64 : i32 to index
    %77 = memref.load %arg2[%76] : memref<8xf32, #tpu.memory_space<smem>>
    memref.store %73, %arg2[%76] : memref<8xf32, #tpu.memory_space<smem>>
    %78 = arith.index_cast %64 : i32 to index
    %79 = memref.load %arg3[%78] : memref<8xf32, #tpu.memory_space<smem>>
    memref.store %75, %arg3[%78] : memref<8xf32, #tpu.memory_space<smem>>
    %c5_i32 = arith.constant 5 : i32
    %c7_i32_8 = arith.constant 7 : i32
    %80 = arith.subi %c7_i32_8, %c5_i32 : i32
    %81 = arith.index_cast %80 : i32 to index
    %82 = memref.load %arg0[%81] : memref<8xf32, #tpu.memory_space<smem>>
    %83 = arith.index_cast %80 : i32 to index
    %84 = memref.load %arg1[%83] : memref<8xf32, #tpu.memory_space<smem>>
    %85 = arith.subf %82, %84 : f32
    %86 = arith.mulf %cst, %68 : f32
    %87 = arith.addf %85, %86 : f32
    %88 = arith.mulf %cst_0, %73 : f32
    %89 = arith.addf %88, %87 : f32
    %90 = arith.mulf %cst, %75 : f32
    %91 = arith.addf %90, %82 : f32
    %92 = arith.index_cast %80 : i32 to index
    %93 = memref.load %arg2[%92] : memref<8xf32, #tpu.memory_space<smem>>
    memref.store %89, %arg2[%92] : memref<8xf32, #tpu.memory_space<smem>>
    %94 = arith.index_cast %80 : i32 to index
    %95 = memref.load %arg3[%94] : memref<8xf32, #tpu.memory_space<smem>>
    memref.store %91, %arg3[%94] : memref<8xf32, #tpu.memory_space<smem>>
    %c6_i32 = arith.constant 6 : i32
    %c7_i32_9 = arith.constant 7 : i32
    %96 = arith.subi %c7_i32_9, %c6_i32 : i32
    %97 = arith.index_cast %96 : i32 to index
    %98 = memref.load %arg0[%97] : memref<8xf32, #tpu.memory_space<smem>>
    %99 = arith.index_cast %96 : i32 to index
    %100 = memref.load %arg1[%99] : memref<8xf32, #tpu.memory_space<smem>>
    %101 = arith.subf %98, %100 : f32
    %102 = arith.mulf %cst, %84 : f32
    %103 = arith.addf %101, %102 : f32
    %104 = arith.mulf %cst_0, %89 : f32
    %105 = arith.addf %104, %103 : f32
    %106 = arith.mulf %cst, %91 : f32
    %107 = arith.addf %106, %98 : f32
    %108 = arith.index_cast %96 : i32 to index
    %109 = memref.load %arg2[%108] : memref<8xf32, #tpu.memory_space<smem>>
    memref.store %105, %arg2[%108] : memref<8xf32, #tpu.memory_space<smem>>
    %110 = arith.index_cast %96 : i32 to index
    %111 = memref.load %arg3[%110] : memref<8xf32, #tpu.memory_space<smem>>
    memref.store %107, %arg3[%110] : memref<8xf32, #tpu.memory_space<smem>>
    %c7_i32_10 = arith.constant 7 : i32
    %c7_i32_11 = arith.constant 7 : i32
    %112 = arith.subi %c7_i32_11, %c7_i32_10 : i32
    %113 = arith.index_cast %112 : i32 to index
    %114 = memref.load %arg0[%113] : memref<8xf32, #tpu.memory_space<smem>>
    %115 = arith.index_cast %112 : i32 to index
    %116 = memref.load %arg1[%115] : memref<8xf32, #tpu.memory_space<smem>>
    %117 = arith.subf %114, %116 : f32
    %118 = arith.mulf %cst, %100 : f32
    %119 = arith.addf %117, %118 : f32
    %120 = arith.mulf %cst_0, %105 : f32
    %121 = arith.addf %120, %119 : f32
    %122 = arith.mulf %cst, %107 : f32
    %123 = arith.addf %122, %114 : f32
    %124 = arith.index_cast %112 : i32 to index
    %125 = memref.load %arg2[%124] : memref<8xf32, #tpu.memory_space<smem>>
    memref.store %121, %arg2[%124] : memref<8xf32, #tpu.memory_space<smem>>
    %126 = arith.index_cast %112 : i32 to index
    %127 = memref.load %arg3[%126] : memref<8xf32, #tpu.memory_space<smem>>
    memref.store %123, %arg3[%126] : memref<8xf32, #tpu.memory_space<smem>>
    %c8_i32 = arith.constant 8 : i32
    return
  }
}

module attributes {stable_mosaic.version = 11 : i64} {
  func.func @_ppo_reduce_kernel(%arg0: i32, %arg1: memref<5x8x128xf32, #tpu.memory_space<vmem>>, %arg2: memref<1x1xf32, #tpu.memory_space<vmem>>, %arg3: memref<8x128xf32, #tpu.memory_space<vmem>>) attributes {dimension_semantics = [#tpu.dimension_semantics<arbitrary>], iteration_bounds = array<i64: 1>, scalar_prefetch = 0 : i64, scratch_operands = 1 : i64, tpu.core_type = #tpu.core_type<tc>, window_params = [{transform_indices = @transform_0, window_bounds = array<i64: 5, 8, 128>}, {pipeline_mode = #tpu.pipeline_mode<synchronous>, transform_indices = @transform_1, window_bounds = array<i64: 1, 1>}]} {
    %c0_i32 = arith.constant 0 : i32
    %0 = arith.cmpi eq, %arg0, %c0_i32 : i32
    %1 = arith.extui %0 : i1 to i32
    %c0_i32_0 = arith.constant 0 : i32
    %2 = arith.cmpi ne, %1, %c0_i32_0 : i32
    scf.if %2 {
      %cst_26 = arith.constant 0.000000e+00 : f32
      %60 = vector.broadcast %cst_26 : f32 to vector<8x128xf32>
      %c0_27 = arith.constant 0 : index
      %c0_28 = arith.constant 0 : index
      %61 = vector.load %arg3[%c0_27, %c0_28] : memref<8x128xf32, #tpu.memory_space<vmem>>, vector<8x128xf32>
      tpu.vector_store %arg3[%c0_27, %c0_28], %60 {strides = array<i32>} : memref<8x128xf32, #tpu.memory_space<vmem>>, vector<8x128xf32>,
    } else {
    }
    %c0 = arith.constant 0 : index
    %c0_1 = arith.constant 0 : index
    %c0_2 = arith.constant 0 : index
    %3 = vector.load %arg1[%c0, %c0_1, %c0_2] : memref<5x8x128xf32, #tpu.memory_space<vmem>>, vector<1x8x128xf32>
    %4 = vector.shape_cast %3 : vector<1x8x128xf32> to vector<8x128xf32>
    %c1 = arith.constant 1 : index
    %c0_3 = arith.constant 0 : index
    %c0_4 = arith.constant 0 : index
    %5 = vector.load %arg1[%c1, %c0_3, %c0_4] : memref<5x8x128xf32, #tpu.memory_space<vmem>>, vector<1x8x128xf32>
    %6 = vector.shape_cast %5 : vector<1x8x128xf32> to vector<8x128xf32>
    %c2 = arith.constant 2 : index
    %c0_5 = arith.constant 0 : index
    %c0_6 = arith.constant 0 : index
    %7 = vector.load %arg1[%c2, %c0_5, %c0_6] : memref<5x8x128xf32, #tpu.memory_space<vmem>>, vector<1x8x128xf32>
    %8 = vector.shape_cast %7 : vector<1x8x128xf32> to vector<8x128xf32>
    %c3 = arith.constant 3 : index
    %c0_7 = arith.constant 0 : index
    %c0_8 = arith.constant 0 : index
    %9 = vector.load %arg1[%c3, %c0_7, %c0_8] : memref<5x8x128xf32, #tpu.memory_space<vmem>>, vector<1x8x128xf32>
    %10 = vector.shape_cast %9 : vector<1x8x128xf32> to vector<8x128xf32>
    %c4 = arith.constant 4 : index
    %c0_9 = arith.constant 0 : index
    %c0_10 = arith.constant 0 : index
    %11 = vector.load %arg1[%c4, %c0_9, %c0_10] : memref<5x8x128xf32, #tpu.memory_space<vmem>>, vector<1x8x128xf32>
    %12 = vector.shape_cast %11 : vector<1x8x128xf32> to vector<8x128xf32>
    %13 = tpu.iota {dimensions = array<i32: 0>} : vector<8x128xi32>
    %c8_i32 = arith.constant 8 : i32
    %14 = arith.muli %arg0, %c8_i32 : i32
    %15 = vector.broadcast %14 : i32 to vector<8x128xi32>
    %16 = arith.addi %13, %15 : vector<8x128xi32>
    %17 = tpu.iota {dimensions = array<i32: 1>} : vector<8x128xi32>
    %c128_i32 = arith.constant 128 : i32
    %18 = vector.broadcast %c128_i32 : i32 to vector<8x128xi32>
    %19 = arith.muli %16, %18 : vector<8x128xi32>
    %20 = arith.addi %19, %17 : vector<8x128xi32>
    %c8_i32_11 = arith.constant 8 : i32
    %21 = vector.broadcast %c8_i32_11 : i32 to vector<8x128xi32>
    %22 = arith.cmpi slt, %20, %21 : vector<8x128xi32>
    %cst = arith.constant 1.000000e+00 : f32
    %23 = vector.broadcast %cst : f32 to vector<8x128xf32>
    %24 = arith.select %22, %6, %23 : vector<8x128xi1>, vector<8x128xf32>
    %25 = tpu.reciprocal %24 {approx = true} : vector<8x128xf32> -> vector<8x128xf32>
    %26 = arith.mulf %24, %25 : vector<8x128xf32>
    %cst_12 = arith.constant 2.000000e+00 : f32
    %27 = vector.broadcast %cst_12 : f32 to vector<8x128xf32>
    %28 = arith.subf %27, %26 : vector<8x128xf32>
    %29 = arith.mulf %25, %28 : vector<8x128xf32>
    %30 = arith.mulf %4, %29 : vector<8x128xf32>
    %cst_13 = arith.constant 8.000000e-01 : f32
    %cst_14 = arith.constant 1.200000e+00 : f32
    %31 = vector.broadcast %cst_13 : f32 to vector<8x128xf32>
    %32 = arith.maximumf %31, %30 : vector<8x128xf32>
    %33 = vector.broadcast %cst_14 : f32 to vector<8x128xf32>
    %34 = arith.minimumf %33, %32 : vector<8x128xf32>
    %35 = arith.mulf %30, %10 : vector<8x128xf32>
    %36 = arith.mulf %34, %10 : vector<8x128xf32>
    %37 = arith.minimumf %35, %36 : vector<8x128xf32>
    %38 = arith.subf %8, %12 : vector<8x128xf32>
    %cst_15 = arith.constant 9.99999974E-6 : f32
    %39 = vector.broadcast %cst_15 : f32 to vector<8x128xf32>
    %40 = arith.addf %4, %39 : vector<8x128xf32>
    %41 = math.log %40 : vector<8x128xf32>
    %42 = arith.mulf %4, %41 : vector<8x128xf32>
    %cst_16 = arith.constant 0.000000e+00 : f32
    %43 = vector.broadcast %cst_16 : f32 to vector<8x128xf32>
    %44 = arith.subf %43, %37 : vector<8x128xf32>
    %45 = arith.mulf %38, %38 : vector<8x128xf32>
    %cst_17 = arith.constant 5.000000e-01 : f32
    %46 = vector.broadcast %cst_17 : f32 to vector<8x128xf32>
    %47 = arith.mulf %46, %45 : vector<8x128xf32>
    %48 = arith.addf %44, %47 : vector<8x128xf32>
    %cst_18 = arith.constant 0.00999999977 : f32
    %49 = vector.broadcast %cst_18 : f32 to vector<8x128xf32>
    %50 = arith.mulf %49, %42 : vector<8x128xf32>
    %51 = arith.subf %48, %50 : vector<8x128xf32>
    %cst_19 = arith.constant 0.000000e+00 : f32
    %52 = vector.broadcast %cst_19 : f32 to vector<8x128xf32>
    %53 = arith.select %22, %51, %52 : vector<8x128xi1>, vector<8x128xf32>
    %c0_20 = arith.constant 0 : index
    %c0_21 = arith.constant 0 : index
    %54 = vector.load %arg3[%c0_20, %c0_21] : memref<8x128xf32, #tpu.memory_space<vmem>>, vector<8x128xf32>
    %55 = arith.addf %54, %53 : vector<8x128xf32>
    %c0_22 = arith.constant 0 : index
    %c0_23 = arith.constant 0 : index
    %56 = vector.load %arg3[%c0_22, %c0_23] : memref<8x128xf32, #tpu.memory_space<vmem>>, vector<8x128xf32>
    tpu.vector_store %arg3[%c0_22, %c0_23], %55 {strides = array<i32>} : memref<8x128xf32, #tpu.memory_space<vmem>>, vector<8x128xf32>,
    %c0_i32_24 = arith.constant 0 : i32
    %57 = arith.cmpi eq, %arg0, %c0_i32_24 : i32
    %58 = arith.extui %57 : i1 to i32
    %c0_i32_25 = arith.constant 0 : i32
    %59 = arith.cmpi ne, %58, %c0_i32_25 : i32
    scf.if %59 {
      %c0_26 = arith.constant 0 : index
      %c0_27 = arith.constant 0 : index
      %60 = vector.load %arg3[%c0_26, %c0_27] : memref<8x128xf32, #tpu.memory_space<vmem>>, vector<8x128xf32>
      %61 = vector.shape_cast %60 : vector<8x128xf32> to vector<1x8x128xf32>
      %cst_28 = arith.constant dense<0.000000e+00> : vector<1xf32>
      %62 = vector.multi_reduction <add>, %61, %cst_28 [1, 2] : vector<1x8x128xf32> to vector<1xf32>
      %63 = vector.shape_cast %62 : vector<1xf32> to vector<1x1x1xf32>
      %64 = vector.extract %63[0, 0, 0] : f32 from vector<1x1x1xf32>
      %65 = vector.broadcast %64 : f32 to vector<1x1xf32>
      %c0_29 = arith.constant 0 : index
      %c0_30 = arith.constant 0 : index
      %66 = vector.load %arg2[%c0_29, %c0_30] : memref<1x1xf32, #tpu.memory_space<vmem>>, vector<1x1xf32>
      tpu.vector_store %arg2[%c0_29, %c0_30], %65 {strides = array<i32>} : memref<1x1xf32, #tpu.memory_space<vmem>>, vector<1x1xf32>,
    } else {
    }
    return
  }
  func.func @transform_0(%arg0: i32) -> (i32, i32, i32) {
    %c0_i32 = arith.constant 0 : i32
    %c0_i32_0 = arith.constant 0 : i32
    %c0_i32_1 = arith.constant 0 : i32
    return %c0_i32, %arg0, %c0_i32_0 : i32, i32, i32
  }
  func.func @transform_1(%arg0: i32) -> (i32, i32) {
    %c0_i32 = arith.constant 0 : i32
    %c0_i32_0 = arith.constant 0 : i32
    %c0_i32_1 = arith.constant 0 : i32
    return %c0_i32, %c0_i32_0 : i32, i32
  }
}

</mosaic_0001>

<bundles_post_ra>
// kernel: ppo_loss.2
= control target key start
LH: loop header
LB: loop body
LE: loop exit
PB: predicated region body
PF: predicated region fallthrough
CT: control target
= control target key end

     0   :  { %s319_s0 = inlined_call_operand.vmem [shape: f32[8], index: 0, kind: input, shape index: {}]   ;;  %s320_s1 = inlined_call_operand.vmem [shape: f32[8], index: 1, kind: input, shape index: {}]   ;;  %s321_s2 = inlined_call_operand.vmem [shape: f32[8], index: 2, kind: output, shape index: {0}]   ;;  %s322_s3 = inlined_call_operand.vmem [shape: f32[8], index: 3, kind: output, shape index: {1}]  }
   0x1   :  { %323 = sst [smem:[#allocation14_spill]] %s322_s3 }
   0x2   :  { %9 = vsyncpa [#allocation3], 0 }
   0x3   :  { %10 = vsyncpa [#allocation6], 0 }
   0x4   :  { %11 = vsyncpa [#allocation4], 0 }
   0x5   :  { %12 = vsyncpa [#allocation9], 0  ;;  %s19_s14 = sshll.u32 %s319_s0, 4  ;;  %s29_s17 = sshll.u32 %s320_s1, 4  ;;  %s20_s14 = int_to_ptr.vmem [resolvable:$true] %s19_s14  ;;  %s30_s17 = int_to_ptr.vmem [resolvable:$true] %s29_s17 }
   0x6   :  { %s190_s18 = scalar_lea.vmem %s20_s14, 16  ;;  %p195_p1 = scmp.lt.s32.totalorder %s20_s14, %s20_s14 }
   0x7   :  { %p191_p0 = scmp.ne.s32.totalorder %s20_s14, %s190_s18  ;;  %p196_p2 = scmp.lt.s32.totalorder %s190_s18, %s190_s18 }
   0x9   :  { %p197_p3 = por %p196_p2, %p195_p1 }
   0xb   :  { %p198_p4 = pnand %p197_p3, %p191_p0 }
   0xd   :  { %201 = shalt.err (!%p198_p4)
}
   0xe   :  { %s246_s19 = smov [#allocation2]   ;;  %s202_s20 = scalar_lea.vmem %s30_s17, 16 }
   0xf   :  { %22 = dma.vmem_to_smem %s20_s14, 16, %s246_s19, [#allocation3]  }
  0x10   :  { %p203_p5 = scmp.ne.s32.totalorder %s30_s17, %s202_s20  ;;  %p207_p6 = scmp.lt.s32.totalorder %s30_s17, %s30_s17 }
  0x11   :  { %p208_p7 = scmp.lt.s32.totalorder %s202_s20, %s202_s20 }
  0x13   :  { %p209_p8 = por %p208_p7, %p207_p6 }
  0x15   :  { %p210_p9 = pnand %p209_p8, %p203_p5 }
  0x17   :  { %213 = shalt.err (!%p210_p9)
}
  0x18   :  { %s247_s0 = smov [#allocation5]  }
  0x19   :  { %32 = dma.vmem_to_smem %s30_s17, 16, %s247_s0, [#allocation6]  }
  0x1a   :  { %238 = dma.done.wait [#allocation3], 16  }
  0x1b   :  { %239 = vsyncadd [#allocation3], 4294967280 }
  0x1c   :  { %240 = dma.done.wait [#allocation6], 16  }
  0x1d   :  { %241 = vsyncadd [#allocation6], 4294967280 }
  0x1e   :  { %39 = sfence }
  0x1f   :  { %s276_s1 = sld [smem:[#allocation2 + $0x7]]  ;;  %s278_s22 = sld [smem:[#allocation2 + $0x6]] }
  0x20   :  { %s173_s21 = sld [smem:[#allocation5 + $0x7]]  ;;  %s175_s23 = sld [smem:[#allocation5 + $0x6]] }
  0x21   :  { %s280_s24 = sld [smem:[#allocation2 + $0x5]]  ;;  %s282_s26 = sld [smem:[#allocation2 + $0x4]] }
  0x22   :  { %s177_s25 = sld [smem:[#allocation5 + $0x5]]  ;;  %s284_s27 = sld [smem:[#allocation5 + $0x4]] }
  0x23   :  { %s288_s7 = sld [smem:[#allocation2 + $0x3]]  ;;  %s291_s11 = sld [smem:[#allocation2 + $0x2]] }
  0x24   :  { %s181_s9 = sld [smem:[#allocation5 + $0x3]]  ;;  %s183_s16 = sld [smem:[#allocation5 + $0x2]] }
  0x25   :  { %s296_s20 = sld [smem:[#allocation2 + $0x1]]  ;;  %49 = sst [smem:[#allocation8 + $0x7]] %s276_s1 }
  0x26   :  { %s42_s28 = ssub.f32 %s276_s1, %s173_s21  ;;  %s53_s29 = smul.f32 0.99, %s173_s21 }
  0x27   :  { %s52_s30 = ssub.f32 %s278_s22, %s175_s23  ;;  %s66_s4 = smul.f32 0.99, %s175_s23 }
  0x28   :  { %47 = sst [smem:[#allocation7 + $0x7]] %s42_s28  ;;  %s55_s5 = smul.f32 0.9405, %s42_s28 }
  0x29   :  { %s54_s6 = sadd.f32 %s53_s29, %s52_s30  ;;  %s79_s13 = smul.f32 0.99, %s177_s25 }
  0x2a   :  { %s65_s8 = ssub.f32 %s280_s24, %s177_s25  ;;  %s92_s18 = smul.f32 0.99, %s284_s27 }
  0x2b   :  { %s56_s10 = sadd.f32 %s55_s5, %s54_s6  ;;  %s185_s23 = sld [smem:[#allocation5 + $0x1]] }
  0x2c   :  { %s67_s12 = sadd.f32 %s66_s4, %s65_s8  ;;  %s105_s29 = smul.f32 0.99, %s181_s9 }
  0x2d   :  { %60 = sst [smem:[#allocation7 + $0x6]] %s56_s10  ;;  %s68_s14 = smul.f32 0.9405, %s56_s10 }
  0x2e   :  { %s78_s15 = ssub.f32 %s282_s26, %s284_s27  ;;  %s299_s4 = sld [smem:[#allocation2]] }
  0x2f   :  { %s69_s17 = sadd.f32 %s68_s14, %s67_s12  ;;  %s129_s6 = sld [smem:[#allocation5]] }
  0x30   :  { %s80_s19 = sadd.f32 %s79_s13, %s78_s15  ;;  %s118_s10 = smul.f32 0.99, %s183_s16 }
  0x31   :  { %73 = sst [smem:[#allocation7 + $0x5]] %s69_s17  ;;  %s81_s0 = smul.f32 0.9405, %s69_s17 }
  0x32   :  { %s91_s21 = ssub.f32 %s288_s7, %s181_s9  ;;  %s131_s9 = smul.f32 0.99, %s185_s23 }
  0x33   :  { %s82_s28 = sadd.f32 %s81_s0, %s80_s19 }
  0x34   :  { %s93_s30 = sadd.f32 %s92_s18, %s91_s21 }
  0x35   :  { %86 = sst [smem:[#allocation7 + $0x4]] %s82_s28  ;;  %s94_s25 = smul.f32 0.9405, %s82_s28 }
  0x36   :  { %s104_s5 = ssub.f32 %s291_s11, %s183_s16  ;;  %s147_s28 = sshll.u32 %s321_s2, 4  ;;  %s148_s28 = int_to_ptr.vmem [resolvable:$true] %s147_s28 }
  0x37   :  { %s95_s27 = sadd.f32 %s94_s25, %s93_s30  ;;  %s57_s30 = smul.f32 0.99, %s276_s1 }
  0x38   :  { %s106_s8 = sadd.f32 %s105_s29, %s104_s5  ;;  %s214_s5 = scalar_lea.vmem %s148_s28, 16 }
  0x39   :  { %99 = sst [smem:[#allocation7 + $0x3]] %s95_s27  ;;  %s107_s12 = smul.f32 0.9405, %s95_s27 }
  0x3a   :  { %s117_s13 = ssub.f32 %s296_s20, %s185_s23  ;;  %p215_p10 = scmp.ne.s32.totalorder %s148_s28, %s214_s5 }
  0x3b   :  { %s108_s14 = sadd.f32 %s107_s12, %s106_s8  ;;  %p219_p11 = scmp.lt.s32.totalorder %s148_s28, %s148_s28 }
  0x3c   :  { %s119_s15 = sadd.f32 %s118_s10, %s117_s13  ;;  %p220_p12 = scmp.lt.s32.totalorder %s214_s5, %s214_s5 }
  0x3d   :  { %112 = sst [smem:[#allocation7 + $0x2]] %s108_s14  ;;  %s120_s17 = smul.f32 0.9405, %s108_s14 }
  0x3e   :  { %s130_s18 = ssub.f32 %s299_s4, %s129_s6  ;;  %p221_p13 = por %p220_p12, %p219_p11 }
  0x3f   :  { %s121_s19 = sadd.f32 %s120_s17, %s119_s15 }
  0x40   :  { %s132_s3 = sadd.f32 %s131_s9, %s130_s18  ;;  %p222_p0 = pnand %p221_p13, %p215_p10 }
  0x41   :  { %125 = sst [smem:[#allocation7 + $0x1]] %s121_s19  ;;  %s133_s16 = smul.f32 0.9405, %s121_s19 }
  0x42   :  { %s58_s25 = sadd.f32 %s278_s22, %s57_s30 }
  0x43   :  { %s134_s29 = sadd.f32 %s133_s16, %s132_s3 }
  0x45   :  { %138 = sst [smem:[#allocation7]] %s134_s29 }
  0x46   :  { %225 = shalt.err (!%p222_p0)
}
  0x47   :  { %s248_s23 = smov [#allocation7]   ;;  %62 = sst [smem:[#allocation8 + $0x6]] %s58_s25 }
  0x48   :  { %150 = dma.smem_to_vmem %s248_s23, 16, %s148_s28, [#allocation4]  }
  0x49   :  { %s70_s2 = smul.f32 0.99, %s58_s25  ;;  %s324_s9 = sld [smem:[#allocation14_spill]] }
  0x4b   :  { %s71_s1 = sadd.f32 %s280_s24, %s70_s2 }
  0x4d   :  { %75 = sst [smem:[#allocation8 + $0x5]] %s71_s1  ;;  %s83_s3 = smul.f32 0.99, %s71_s1 }
  0x4f   :  { %s84_s22 = sadd.f32 %s282_s26, %s83_s3  ;;  %s157_s17 = sshll.u32 %s324_s9, 4  ;;  %s158_s17 = int_to_ptr.vmem [resolvable:$true] %s157_s17 }
  0x50   :  { %s226_s19 = scalar_lea.vmem %s158_s17, 16  ;;  %p231_p2 = scmp.lt.s32.totalorder %s158_s17, %s158_s17 }
  0x51   :  { %88 = sst [smem:[#allocation8 + $0x4]] %s84_s22  ;;  %s96_s6 = smul.f32 0.99, %s84_s22 }
  0x52   :  { %p227_p1 = scmp.ne.s32.totalorder %s158_s17, %s226_s19  ;;  %p232_p3 = scmp.lt.s32.totalorder %s226_s19, %s226_s19 }
  0x53   :  { %s97_s27 = sadd.f32 %s288_s7, %s96_s6 }
  0x54   :  { %p233_p4 = por %p232_p3, %p231_p2 }
  0x55   :  { %101 = sst [smem:[#allocation8 + $0x3]] %s97_s27  ;;  %s109_s8 = smul.f32 0.99, %s97_s27 }
  0x56   :  { %p234_p5 = pnand %p233_p4, %p227_p1 }
  0x57   :  { %s110_s10 = sadd.f32 %s291_s11, %s109_s8 }
  0x59   :  { %114 = sst [smem:[#allocation8 + $0x2]] %s110_s10  ;;  %s122_s12 = smul.f32 0.99, %s110_s10 }
  0x5b   :  { %s123_s13 = sadd.f32 %s296_s20, %s122_s12 }
  0x5d   :  { %127 = sst [smem:[#allocation8 + $0x1]] %s123_s13  ;;  %s135_s18 = smul.f32 0.99, %s123_s13 }
  0x5f   :  { %s136_s24 = sadd.f32 %s135_s18, %s299_s4 }
  0x61   :  { %140 = sst [smem:[#allocation8]] %s136_s24 }
  0x62   :  { %237 = shalt.err (!%p234_p5)
}
  0x63   :  { %s249_s26 = smov [#allocation8]  }
  0x64   :  { %160 = dma.smem_to_vmem %s249_s26, 16, %s158_s17, [#allocation9]  }
  0x65   :  { %242 = dma.done.wait [#allocation4], 16  }
  0x66   :  { %243 = vsyncadd [#allocation4], 4294967280 }
  0x67   :  { %244 = dma.done.wait [#allocation9], 16  }
  0x68   :  { %245 = vsyncadd [#allocation9], 4294967280 }
  0x69   :  { %167 = sfence }
  0x6a   :  { %168 = vsyncpa [#allocation3], 1 }
  0x6b   :  { %169 = vsyncpa [#allocation6], 1 }
  0x6c   :  { %170 = vsyncpa [#allocation4], 1 }
  0x6d   :  { %171 = vsyncpa [#allocation9], 1 }

// kernel: ppo_loss.3
= control target key start
LH: loop header
LB: loop body
LE: loop exit
PB: predicated region body
PF: predicated region fallthrough
CT: control target
= control target key end

     0   :  { %v23_v0 = vlaneseq  ;;  %s164_s0 = inlined_call_operand.vmem [shape: f32[5,8,128], index: 0, kind: input, shape index: {}]   ;;  %s165_s1 = inlined_call_operand.hbm [shape: f32[1,1], index: 1, kind: output, shape index: {}]  }
   0x1   :  { %6 = vsyncpa [#allocation4], 0  ;;  %v89_v4 = vld [vmem:[%s164_s0 + $0x8] sm:$0xff]  ;;  %v14_v6 = vld [vmem:[%s164_s0] sm:$0xff]  ;;  %vm73_vm1 = vcmask 0  }
   0x2   :  { %v24_v1 = vshrl.u32 %v23_v0, 7  ;;  %v29_v2 = vand.u32 127, %v23_v0  ;;  %v45_v8 = vadd.f32 1e-05, %v14_v6  ;;  %v90_v12 = vld [vmem:[%s164_s0 + $0x10] sm:$0xff]  ;;  %v92_v13 = vld [vmem:[%s164_s0 + $0x20] sm:$0xff] }
   0x3   :  { %v44_v17 = vsub.f32 %v90_v12, %v92_v13  ;;  %v91_v18 = vld [vmem:[%s164_s0 + $0x18] sm:$0xff]  ;;  %s124_s0 = smov [#allocation3]  }
   0x4   :  { %v30_v3 = vmul.u32 128, %v24_v1  ;;  %s81_s16 = sshll.u32 %s124_s0, 4  ;;  %s82_s16 = int_to_ptr.vmem [resolvable:$true] %s81_s16 }
   0x5   :  { %v50_v23 = vmul.f32 %v44_v17, %v44_v17  ;;  %s100_s18 = scalar_lea.vmem %s82_s16, 16  ;;  %s104_s19 = scalar_lea.vmem %s82_s16, 32 }
   0x6   :  { %v31_v5 = vadd.s32 %v30_v3, %v29_v2  ;;  %p101_p0 = scmp.ne.s32.totalorder %s82_s16, %s100_s18  ;;  %p105_p1 = scmp.lt.s32.totalorder %s82_s16, %s82_s16 }
   0x7   :  { %v51_v27 = vmul.f32 0.5, %v50_v23  ;;  %p106_p2 = scmp.lt.s32.totalorder %s104_s19, %s100_s18 }
   0x8   :  { %vm32_vm0 = vcmp.lt.s32.totalorder %v31_v5, 8 }
   0x9   :  { %v33_v7 = vsel %vm32_vm0, %v89_v4, 1.0  ;;  %p107_p3 = por %p106_p2, %p105_p1 }
   0xa   :  { %96 = vrcp.f32 %v33_v7 }
   0xb   :  { %98 = vlog2.f32 %v45_v8  ;;  %p108_p4 = pnand %p107_p3, %p101_p0 }
  0x14   :  { %v97_v9 = vpop.eup %96 }
  0x15   :  { %v35_v10 = vmul.f32 %v97_v9, %v33_v7  ;;  %v99_v15 = vpop.eup %98 }
  0x16   :  { %v47_v20 = vmul.f32 0.6931472, %v99_v15 }
  0x17   :  { %v36_v11 = vsub.f32 2.0, %v35_v10 }
  0x18   :  { %v48_v25 = vmul.f32 %v47_v20, %v14_v6 }
  0x19   :  { %v37_v14 = vmul.f32 %v97_v9, %v36_v11 }
  0x1a   :  { %v53_v29 = vmul.f32 0.01, %v48_v25 }
  0x1b   :  { %v38_v16 = vmul.f32 %v37_v14, %v14_v6 }
  0x1d   :  { %v39_v19 = vmax.f32 %v38_v16, 0.8  ;;  %v41_v22 = vmul.f32 %v91_v18, %v38_v16 }
  0x1f   :  { %v40_v21 = vmin.f32 %v39_v19, 1.2 }
  0x21   :  { %v42_v24 = vmul.f32 %v91_v18, %v40_v21 }
  0x23   :  { %v43_v26 = vmin.f32 %v41_v22, %v42_v24 }
  0x25   :  { %v49_v28 = vsub.f32 0.0, %v43_v26 }
  0x27   :  { %v52_v30 = vadd.f32 %v51_v27, %v49_v28 }
  0x29   :  { %v54_v31 = vsub.f32 %v52_v30, %v53_v29 }
  0x2b   :  { %v55_v32 = vsel %vm32_vm0, %v54_v31, 0.0 }
  0x2c   :  { %63 = vadd.xlane.f32.xlu0 %v55_v32 }
  0xb9   :  { %v64_v33 = vpop.xlane.xlu0 %63 }
  0xba   :  { %v65_v34 = vrot.slane %v64_v33, 4 }
  0xbc   :  { %v66_v35 = vadd.f32 %v65_v34, %v64_v33 }
  0xbe   :  { %v67_v36 = vrot.slane %v66_v35, 2 }
  0xc0   :  { %v68_v37 = vadd.f32 %v67_v36, %v66_v35 }
  0xc2   :  { %v69_v38 = vrot.slane %v68_v37, 1 }
  0xc4   :  { %v70_v39 = vadd.f32 %v69_v38, %v68_v37 }
  0xc6   :  { %93 = vpush %v70_v39 }
  0xf7   :  { %s94_s17 = spop %93 }
  0xf8   :  { %v72_v40 = vstv %s94_s17 }
  0xf9   :  { %74 = vst.msk [vmem:[#allocation3] sm:$0x1] %vm73_vm1, %v72_v40 }
  0xfa   :  { %111 = shalt.err (!%p108_p4)
}
  0xfb   :  { %s112_s22 = scalar_lea.hbm %s165_s1, 16 }
  0xfc   :  { %p113_p5 = scmp.ne.s32.totalorder %s165_s1, %s112_s22  ;;  %p116_p6 = scmp.lt.u32.totalorder %s112_s22, %s165_s1 }
  0xfe   :  { %p118_p7 = pnand %p116_p6, %p113_p5 }
 0x100   :  { %121 = shalt.err (!%p118_p7)
}
 0x101   :  { %84 = dma.vmem_to_hbm [thread:$0]  %s82_s16, 16, %s165_s1, [#allocation4]  }
 0x102   :  { %122 = dma.done.wait [#allocation4], 16  }
 0x103   :  { %123 = vsyncadd [#allocation4], 4294967280 }
 0x104   :  { %88 = vsyncpa [#allocation4], 1 }

</bundles_post_ra>
